<compile_context>
chip_gen: v5e
topology: v5e:2x2
jax: 0.10.0
libtpu: 0.0.40
codegen_flags: <defaults>
</compile_context>

<pallas_src>
import math

import jax
import jax.numpy as jnp
from jax import lax
from jax.experimental import pallas as pl
from jax.experimental.pallas import tpu as pltpu

C_IN, C_OUT, K = 1, 3, 3


def conv2d_kernel(w_ref, b_ref, x_ref, o_ref, rolls_ref):
    # w_ref    : (C_OUT*K*K,)   SMEM  flattened 3x3 filters (C_in == 1)
    # b_ref    : (C_OUT,)       SMEM
    # x_ref    : (H, L)         VMEM  L = nb*W (nb images side-by-side on lanes)
    # o_ref    : (C_OUT, OH, L) VMEM  lane-dense; cols >= OW per image are junk
    # rolls_ref: (K-1, H, L)    VMEM  scratch: lane-rolled copies of the input
    H, L = x_ref.shape
    OH = H - K + 1

    x = x_ref[...]
    # kj lane shifts on the XLU; stored to VMEM so the ki (sublane-offset)
    # windows below are plain addressed loads instead of cross-sublane
    # shuffles of vreg-resident data.
    rolls_ref[0] = pltpu.roll(x, shift=L - 1, axis=1)   # x[h, (l+1) % L]
    rolls_ref[1] = pltpu.roll(x, shift=L - 2, axis=1)   # x[h, (l+2) % L]

    # Per-channel accumulators, initialized with the bias.
    accs = [jnp.full((OH, L), b_ref[co], jnp.float32) for co in range(C_OUT)]

    # Tap-major loop nest: one (OH, L) window + 3 accumulators live at a time.
    for ki in range(K):
        for kj in range(K):
            if kj == 0:
                win = x_ref[pl.ds(ki, OH), :]
            else:
                win = rolls_ref[kj - 1, pl.ds(ki, OH), :]
            for co in range(C_OUT):
                accs[co] = accs[co] + win * w_ref[co * K * K + ki * K + kj]

    for co in range(C_OUT):
        # One wide, unmasked (OH x L) lane-dense store per channel.
        o_ref[co] = accs[co].astype(o_ref.dtype)


def _choose_nb(N, H, W):
    """Images per grid step: lane-dense L, ~1 MiB blocks, >= 4 grid steps."""
    OH = H - K + 1
    # (a) smallest nb making L = nb*W a multiple of 128 -> unmasked stores.
    base = 128 // math.gcd(W, 128)
    # (b) cap per-step (input + output) block near 1 MiB so double-buffered
    #     blocks stay well inside even v7x's 64 MiB VMEM for large images.
    bytes_per_img = 4 * (H * W + C_OUT * OH * W)
    cap_vmem = max(1, (1 << 20) // max(1, bytes_per_img))
    # (c) keep >= 4 grid steps when N allows (pipelining on both v7x cores).
    cap_grid = max(1, N // 4)
    nb = min(cap_vmem, cap_grid)
    if nb >= base:
        nb = (nb // base) * base          # keep L a multiple of 128
    return max(1, min(nb, N))


def conv2d_pallas(x, weight, bias, *, batch_tile=None):
    """x: (N,1,H,W), weight: (3,1,3,3), bias: (3,) -> (N,3,H-2,W-2)."""
    N, Cin, H, W = x.shape
    # The lane-roll trick assumes exactly this conv config: rolled lanes only
    # contaminate the K-1 rightmost (discarded) columns of each image.
    assert Cin == C_IN, Cin
    assert K == 3 and weight.shape == (C_OUT, C_IN, K, K), weight.shape
    assert H >= K and W >= K, (H, W)
    OH, OW = H - K + 1, W - K + 1

    nb = _choose_nb(N, H, W) if batch_tile is None else max(1, min(batch_tile, N))
    G = pl.cdiv(N, nb)                   # grid steps (batch tiles)
    n_pad = G * nb
    if n_pad != N:
        x = jnp.pad(x, ((0, n_pad - N), (0, 0), (0, 0), (0, 0)))

    L = nb * W  # multiple of 128 whenever possible -> lane-dense stores
    # (n_pad,1,H,W) -> (G, nb, H, W) -> (G, H, nb, W) -> (G, H, nb*W)
    # TODO(synk): if the consumer can take the packed (G,C_OUT,OH,nb,W) layout
    # directly, the repack/unpack HBM passes around the kernel can be dropped.
    x_t = (x[:, 0]
           .reshape(G, nb, H, W)
           .transpose(0, 2, 1, 3)
           .reshape(G, H, L))

    w_flat = weight.reshape(C_OUT * C_IN * K * K)   # (27,) -> SMEM
    bias = bias.reshape(C_OUT)                      # (3,)  -> SMEM

    # Explicit VMEM budget: double-buffered in/out blocks + roll scratch.
    block_bytes = 4 * (H * L + C_OUT * OH * L)
    scratch_bytes = 4 * (K - 1) * H * L
    vmem_limit = int(min(96 << 20,
                         max(2 * (2 * block_bytes + scratch_bytes), 16 << 20)))

    cost = pl.CostEstimate(
        flops=2 * G * C_OUT * K * K * OH * L,
        transcendentals=0,
        bytes_accessed=(x_t.size + G * C_OUT * OH * L
                        + w_flat.size + bias.size) * 4,
    )

    out = pl.pallas_call(
        conv2d_kernel,
        out_shape=jax.ShapeDtypeStruct((G, C_OUT, OH, L), x.dtype),
        grid=(G,),
        in_specs=[
            pl.BlockSpec(memory_space=pltpu.MemorySpace.SMEM),          # weights
            pl.BlockSpec(memory_space=pltpu.MemorySpace.SMEM),          # bias
            pl.BlockSpec((pl.Squeezed(), H, L), lambda g: (g, 0, 0)),   # input
        ],
        out_specs=pl.BlockSpec((pl.Squeezed(), C_OUT, OH, L),
                               lambda g: (g, 0, 0, 0)),
        scratch_shapes=[pltpu.VMEM((K - 1, H, L), jnp.float32)],
        compiler_params=pltpu.CompilerParams(
            dimension_semantics=("parallel",),
            vmem_limit_bytes=vmem_limit),
        cost_estimate=cost,
    )(w_flat, bias, x_t)

    # Undo the lane packing: keep only the OW valid columns of each image.
    out = out.reshape(G, C_OUT, OH, nb, W)[..., :OW]
    out = out.transpose(0, 3, 1, 2, 4).reshape(n_pad, C_OUT, OH, OW)
    return out[:N]


def conv2d_reference(x, weight, bias):
    # Plain-JAX reference (matches torch.nn.functional.conv2d, NCHW/OIHW).
    out = lax.conv_general_dilated(
        x, weight, window_strides=(1, 1), padding="VALID",
        dimension_numbers=("NCHW", "OIHW", "NCHW"),
        precision=lax.Precision.HIGHEST)
    return out + bias.reshape(1, C_OUT, 1, 1)


if __name__ == "__main__":
    key = jax.random.PRNGKey(0)
    k_x, k_w, k_b = jax.random.split(key, 3)

    # 64 single-channel 16x16 images -> nb=16, L=256, G=4 grid steps:
    # >= 4 parallel steps so both v7x TensorCores pipeline, lane-dense stores.
    N, H, W = 64, 16, 16
    x = jax.random.normal(k_x, (N, C_IN, H, W), dtype=jnp.float32)

    # Deterministic PyTorch-style uniform(-1/sqrt(fan_in), +1/sqrt(fan_in)) init.
    fan_in = C_IN * K * K
    bound = 1.0 / (fan_in ** 0.5)
    weight = jax.random.uniform(k_w, (C_OUT, C_IN, K, K),
                                minval=-bound, maxval=bound, dtype=jnp.float32)
    bias = jax.random.uniform(k_b, (C_OUT,),
                              minval=-bound, maxval=bound, dtype=jnp.float32)

    out = conv2d_pallas(x, weight, bias)
    out = jax.block_until_ready(out)

    ref = conv2d_reference(x, weight, bias)
    assert out.shape == (N, C_OUT, H - 2, W - 2), out.shape
    assert jnp.allclose(out, ref, atol=1e-5, rtol=1e-5), \
        float(jnp.max(jnp.abs(out - ref)))

    print("KERNEL_OK")
</pallas_src>

<mosaic_0001>
module attributes {stable_mosaic.version = 11 : i64} {
  func.func @conv2d_kernel(%arg0: i32, %arg1: memref<27xf32, #tpu.memory_space<smem>>, %arg2: memref<3xf32, #tpu.memory_space<smem>>, %arg3: memref<1x16x256xf32, #tpu.memory_space<vmem>>, %arg4: memref<1x3x14x256xf32, #tpu.memory_space<vmem>>, %arg5: memref<2x16x256xf32, #tpu.memory_space<vmem>>) attributes {dimension_semantics = [#tpu.dimension_semantics<parallel>], iteration_bounds = array<i64: 4>, scalar_prefetch = 0 : i64, scratch_operands = 1 : i64, tpu.core_type = #tpu.core_type<tc>, window_params = [{transform_indices = @transform_0, window_bounds = array<i64: 27>}, {transform_indices = @transform_1, window_bounds = array<i64: 3>}, {transform_indices = @transform_2, window_bounds = array<i64: 1, 16, 256>}, {transform_indices = @transform_3, window_bounds = array<i64: 1, 3, 14, 256>}]} {
    %c0 = arith.constant 0 : index
    %c0_0 = arith.constant 0 : index
    %c0_1 = arith.constant 0 : index
    %0 = vector.load %arg3[%c0, %c0_0, %c0_1] : memref<1x16x256xf32, #tpu.memory_space<vmem>>, vector<1x16x256xf32>
    %1 = vector.shape_cast %0 : vector<1x16x256xf32> to vector<16x256xf32>
    %c255_i32 = arith.constant 255 : i32
    %2 = tpu.dynamic_rotate %1 by %c255_i32 dim 1 : vector<16x256xf32>, i32 -> vector<16x256xf32>
    %c0_2 = arith.constant 0 : index
    %c0_3 = arith.constant 0 : index
    %c0_4 = arith.constant 0 : index
    %3 = vector.load %arg5[%c0_2, %c0_3, %c0_4] : memref<2x16x256xf32, #tpu.memory_space<vmem>>, vector<1x16x256xf32>
    %4 = vector.shape_cast %3 : vector<1x16x256xf32> to vector<16x256xf32>
    %5 = vector.shape_cast %2 : vector<16x256xf32> to vector<1x16x256xf32>
    tpu.vector_store %arg5[%c0_2, %c0_3, %c0_4], %5 {strides = array<i32>} : memref<2x16x256xf32, #tpu.memory_space<vmem>>, vector<1x16x256xf32>,
    %c254_i32 = arith.constant 254 : i32
    %6 = tpu.dynamic_rotate %1 by %c254_i32 dim 1 : vector<16x256xf32>, i32 -> vector<16x256xf32>
    %c1 = arith.constant 1 : index
    %c0_5 = arith.constant 0 : index
    %c0_6 = arith.constant 0 : index
    %7 = vector.load %arg5[%c1, %c0_5, %c0_6] : memref<2x16x256xf32, #tpu.memory_space<vmem>>, vector<1x16x256xf32>
    %8 = vector.shape_cast %7 : vector<1x16x256xf32> to vector<16x256xf32>
    %9 = vector.shape_cast %6 : vector<16x256xf32> to vector<1x16x256xf32>
    tpu.vector_store %arg5[%c1, %c0_5, %c0_6], %9 {strides = array<i32>} : memref<2x16x256xf32, #tpu.memory_space<vmem>>, vector<1x16x256xf32>,
    %c0_7 = arith.constant 0 : index
    %10 = memref.load %arg2[%c0_7] : memref<3xf32, #tpu.memory_space<smem>>
    %11 = vector.broadcast %10 : f32 to vector<14x256xf32>
    %c1_8 = arith.constant 1 : index
    %12 = memref.load %arg2[%c1_8] : memref<3xf32, #tpu.memory_space<smem>>
    %13 = vector.broadcast %12 : f32 to vector<14x256xf32>
    %c2 = arith.constant 2 : index
    %14 = memref.load %arg2[%c2] : memref<3xf32, #tpu.memory_space<smem>>
    %15 = vector.broadcast %14 : f32 to vector<14x256xf32>
    %c0_9 = arith.constant 0 : index
    %c0_10 = arith.constant 0 : index
    %c0_11 = arith.constant 0 : index
    %16 = vector.load %arg3[%c0_9, %c0_10, %c0_11] : memref<1x16x256xf32, #tpu.memory_space<vmem>>, vector<1x14x256xf32>
    %17 = vector.shape_cast %16 : vector<1x14x256xf32> to vector<14x256xf32>
    %c0_12 = arith.constant 0 : index
    %18 = memref.load %arg1[%c0_12] : memref<27xf32, #tpu.memory_space<smem>>
    %19 = vector.broadcast %18 : f32 to vector<14x256xf32>
    %20 = arith.mulf %17, %19 : vector<14x256xf32>
    %21 = arith.addf %11, %20 : vector<14x256xf32>
    %c9 = arith.constant 9 : index
    %22 = memref.load %arg1[%c9] : memref<27xf32, #tpu.memory_space<smem>>
    %23 = vector.broadcast %22 : f32 to vector<14x256xf32>
    %24 = arith.mulf %17, %23 : vector<14x256xf32>
    %25 = arith.addf %13, %24 : vector<14x256xf32>
    %c18 = arith.constant 18 : index
    %26 = memref.load %arg1[%c18] : memref<27xf32, #tpu.memory_space<smem>>
    %27 = vector.broadcast %26 : f32 to vector<14x256xf32>
    %28 = arith.mulf %17, %27 : vector<14x256xf32>
    %29 = arith.addf %15, %28 : vector<14x256xf32>
    %c0_13 = arith.constant 0 : index
    %c0_14 = arith.constant 0 : index
    %c0_15 = arith.constant 0 : index
    %30 = vector.load %arg5[%c0_13, %c0_14, %c0_15] : memref<2x16x256xf32, #tpu.memory_space<vmem>>, vector<1x14x256xf32>
    %31 = vector.shape_cast %30 : vector<1x14x256xf32> to vector<14x256xf32>
    %c1_16 = arith.constant 1 : index
    %32 = memref.load %arg1[%c1_16] : memref<27xf32, #tpu.memory_space<smem>>
    %33 = vector.broadcast %32 : f32 to vector<14x256xf32>
    %34 = arith.mulf %31, %33 : vector<14x256xf32>
    %35 = arith.addf %21, %34 : vector<14x256xf32>
    %c10 = arith.constant 10 : index
    %36 = memref.load %arg1[%c10] : memref<27xf32, #tpu.memory_space<smem>>
    %37 = vector.broadcast %36 : f32 to vector<14x256xf32>
    %38 = arith.mulf %31, %37 : vector<14x256xf32>
    %39 = arith.addf %25, %38 : vector<14x256xf32>
    %c19 = arith.constant 19 : index
    %40 = memref.load %arg1[%c19] : memref<27xf32, #tpu.memory_space<smem>>
    %41 = vector.broadcast %40 : f32 to vector<14x256xf32>
    %42 = arith.mulf %31, %41 : vector<14x256xf32>
    %43 = arith.addf %29, %42 : vector<14x256xf32>
    %c1_17 = arith.constant 1 : index
    %c0_18 = arith.constant 0 : index
    %c0_19 = arith.constant 0 : index
    %44 = vector.load %arg5[%c1_17, %c0_18, %c0_19] : memref<2x16x256xf32, #tpu.memory_space<vmem>>, vector<1x14x256xf32>
    %45 = vector.shape_cast %44 : vector<1x14x256xf32> to vector<14x256xf32>
    %c2_20 = arith.constant 2 : index
    %46 = memref.load %arg1[%c2_20] : memref<27xf32, #tpu.memory_space<smem>>
    %47 = vector.broadcast %46 : f32 to vector<14x256xf32>
    %48 = arith.mulf %45, %47 : vector<14x256xf32>
    %49 = arith.addf %35, %48 : vector<14x256xf32>
    %c11 = arith.constant 11 : index
    %50 = memref.load %arg1[%c11] : memref<27xf32, #tpu.memory_space<smem>>
    %51 = vector.broadcast %50 : f32 to vector<14x256xf32>
    %52 = arith.mulf %45, %51 : vector<14x256xf32>
    %53 = arith.addf %39, %52 : vector<14x256xf32>
    %c20 = arith.constant 20 : index
    %54 = memref.load %arg1[%c20] : memref<27xf32, #tpu.memory_space<smem>>
    %55 = vector.broadcast %54 : f32 to vector<14x256xf32>
    %56 = arith.mulf %45, %55 : vector<14x256xf32>
    %57 = arith.addf %43, %56 : vector<14x256xf32>
    %c0_21 = arith.constant 0 : index
    %c1_22 = arith.constant 1 : index
    %c0_23 = arith.constant 0 : index
    %58 = vector.load %arg3[%c0_21, %c1_22, %c0_23] : memref<1x16x256xf32, #tpu.memory_space<vmem>>, vector<1x14x256xf32>
    %59 = vector.shape_cast %58 : vector<1x14x256xf32> to vector<14x256xf32>
    %c3 = arith.constant 3 : index
    %60 = memref.load %arg1[%c3] : memref<27xf32, #tpu.memory_space<smem>>
    %61 = vector.broadcast %60 : f32 to vector<14x256xf32>
    %62 = arith.mulf %59, %61 : vector<14x256xf32>
    %63 = arith.addf %49, %62 : vector<14x256xf32>
    %c12 = arith.constant 12 : index
    %64 = memref.load %arg1[%c12] : memref<27xf32, #tpu.memory_space<smem>>
    %65 = vector.broadcast %64 : f32 to vector<14x256xf32>
    %66 = arith.mulf %59, %65 : vector<14x256xf32>
    %67 = arith.addf %53, %66 : vector<14x256xf32>
    %c21 = arith.constant 21 : index
    %68 = memref.load %arg1[%c21] : memref<27xf32, #tpu.memory_space<smem>>
    %69 = vector.broadcast %68 : f32 to vector<14x256xf32>
    %70 = arith.mulf %59, %69 : vector<14x256xf32>
    %71 = arith.addf %57, %70 : vector<14x256xf32>
    %c0_24 = arith.constant 0 : index
    %c1_25 = arith.constant 1 : index
    %c0_26 = arith.constant 0 : index
    %72 = vector.load %arg5[%c0_24, %c1_25, %c0_26] : memref<2x16x256xf32, #tpu.memory_space<vmem>>, vector<1x14x256xf32>
    %73 = vector.shape_cast %72 : vector<1x14x256xf32> to vector<14x256xf32>
    %c4 = arith.constant 4 : index
    %74 = memref.load %arg1[%c4] : memref<27xf32, #tpu.memory_space<smem>>
    %75 = vector.broadcast %74 : f32 to vector<14x256xf32>
    %76 = arith.mulf %73, %75 : vector<14x256xf32>
    %77 = arith.addf %63, %76 : vector<14x256xf32>
    %c13 = arith.constant 13 : index
    %78 = memref.load %arg1[%c13] : memref<27xf32, #tpu.memory_space<smem>>
    %79 = vector.broadcast %78 : f32 to vector<14x256xf32>
    %80 = arith.mulf %73, %79 : vector<14x256xf32>
    %81 = arith.addf %67, %80 : vector<14x256xf32>
    %c22 = arith.constant 22 : index
    %82 = memref.load %arg1[%c22] : memref<27xf32, #tpu.memory_space<smem>>
    %83 = vector.broadcast %82 : f32 to vector<14x256xf32>
    %84 = arith.mulf %73, %83 : vector<14x256xf32>
    %85 = arith.addf %71, %84 : vector<14x256xf32>
    %c1_27 = arith.constant 1 : index
    %c1_28 = arith.constant 1 : index
    %c0_29 = arith.constant 0 : index
    %86 = vector.load %arg5[%c1_27, %c1_28, %c0_29] : memref<2x16x256xf32, #tpu.memory_space<vmem>>, vector<1x14x256xf32>
    %87 = vector.shape_cast %86 : vector<1x14x256xf32> to vector<14x256xf32>
    %c5 = arith.constant 5 : index
    %88 = memref.load %arg1[%c5] : memref<27xf32, #tpu.memory_space<smem>>
    %89 = vector.broadcast %88 : f32 to vector<14x256xf32>
    %90 = arith.mulf %87, %89 : vector<14x256xf32>
    %91 = arith.addf %77, %90 : vector<14x256xf32>
    %c14 = arith.constant 14 : index
    %92 = memref.load %arg1[%c14] : memref<27xf32, #tpu.memory_space<smem>>
    %93 = vector.broadcast %92 : f32 to vector<14x256xf32>
    %94 = arith.mulf %87, %93 : vector<14x256xf32>
    %95 = arith.addf %81, %94 : vector<14x256xf32>
    %c23 = arith.constant 23 : index
    %96 = memref.load %arg1[%c23] : memref<27xf32, #tpu.memory_space<smem>>
    %97 = vector.broadcast %96 : f32 to vector<14x256xf32>
    %98 = arith.mulf %87, %97 : vector<14x256xf32>
    %99 = arith.addf %85, %98 : vector<14x256xf32>
    %c0_30 = arith.constant 0 : index
    %c2_31 = arith.constant 2 : index
    %c0_32 = arith.constant 0 : index
    %100 = vector.load %arg3[%c0_30, %c2_31, %c0_32] : memref<1x16x256xf32, #tpu.memory_space<vmem>>, vector<1x14x256xf32>
    %101 = vector.shape_cast %100 : vector<1x14x256xf32> to vector<14x256xf32>
    %c6 = arith.constant 6 : index
    %102 = memref.load %arg1[%c6] : memref<27xf32, #tpu.memory_space<smem>>
    %103 = vector.broadcast %102 : f32 to vector<14x256xf32>
    %104 = arith.mulf %101, %103 : vector<14x256xf32>
    %105 = arith.addf %91, %104 : vector<14x256xf32>
    %c15 = arith.constant 15 : index
    %106 = memref.load %arg1[%c15] : memref<27xf32, #tpu.memory_space<smem>>
    %107 = vector.broadcast %106 : f32 to vector<14x256xf32>
    %108 = arith.mulf %101, %107 : vector<14x256xf32>
    %109 = arith.addf %95, %108 : vector<14x256xf32>
    %c24 = arith.constant 24 : index
    %110 = memref.load %arg1[%c24] : memref<27xf32, #tpu.memory_space<smem>>
    %111 = vector.broadcast %110 : f32 to vector<14x256xf32>
    %112 = arith.mulf %101, %111 : vector<14x256xf32>
    %113 = arith.addf %99, %112 : vector<14x256xf32>
    %c0_33 = arith.constant 0 : index
    %c2_34 = arith.constant 2 : index
    %c0_35 = arith.constant 0 : index
    %114 = vector.load %arg5[%c0_33, %c2_34, %c0_35] : memref<2x16x256xf32, #tpu.memory_space<vmem>>, vector<1x14x256xf32>
    %115 = vector.shape_cast %114 : vector<1x14x256xf32> to vector<14x256xf32>
    %c7 = arith.constant 7 : index
    %116 = memref.load %arg1[%c7] : memref<27xf32, #tpu.memory_space<smem>>
    %117 = vector.broadcast %116 : f32 to vector<14x256xf32>
    %118 = arith.mulf %115, %117 : vector<14x256xf32>
    %119 = arith.addf %105, %118 : vector<14x256xf32>
    %c16 = arith.constant 16 : index
    %120 = memref.load %arg1[%c16] : memref<27xf32, #tpu.memory_space<smem>>
    %121 = vector.broadcast %120 : f32 to vector<14x256xf32>
    %122 = arith.mulf %115, %121 : vector<14x256xf32>
    %123 = arith.addf %109, %122 : vector<14x256xf32>
    %c25 = arith.constant 25 : index
    %124 = memref.load %arg1[%c25] : memref<27xf32, #tpu.memory_space<smem>>
    %125 = vector.broadcast %124 : f32 to vector<14x256xf32>
    %126 = arith.mulf %115, %125 : vector<14x256xf32>
    %127 = arith.addf %113, %126 : vector<14x256xf32>
    %c1_36 = arith.constant 1 : index
    %c2_37 = arith.constant 2 : index
    %c0_38 = arith.constant 0 : index
    %128 = vector.load %arg5[%c1_36, %c2_37, %c0_38] : memref<2x16x256xf32, #tpu.memory_space<vmem>>, vector<1x14x256xf32>
    %129 = vector.shape_cast %128 : vector<1x14x256xf32> to vector<14x256xf32>
    %c8 = arith.constant 8 : index
    %130 = memref.load %arg1[%c8] : memref<27xf32, #tpu.memory_space<smem>>
    %131 = vector.broadcast %130 : f32 to vector<14x256xf32>
    %132 = arith.mulf %129, %131 : vector<14x256xf32>
    %133 = arith.addf %119, %132 : vector<14x256xf32>
    %c17 = arith.constant 17 : index
    %134 = memref.load %arg1[%c17] : memref<27xf32, #tpu.memory_space<smem>>
    %135 = vector.broadcast %134 : f32 to vector<14x256xf32>
    %136 = arith.mulf %129, %135 : vector<14x256xf32>
    %137 = arith.addf %123, %136 : vector<14x256xf32>
    %c26 = arith.constant 26 : index
    %138 = memref.load %arg1[%c26] : memref<27xf32, #tpu.memory_space<smem>>
    %139 = vector.broadcast %138 : f32 to vector<14x256xf32>
    %140 = arith.mulf %129, %139 : vector<14x256xf32>
    %141 = arith.addf %127, %140 : vector<14x256xf32>
    %c0_39 = arith.constant 0 : index
    %c0_40 = arith.constant 0 : index
    %c0_41 = arith.constant 0 : index
    %c0_42 = arith.constant 0 : index
    %142 = vector.load %arg4[%c0_39, %c0_40, %c0_41, %c0_42] : memref<1x3x14x256xf32, #tpu.memory_space<vmem>>, vector<1x1x14x256xf32>
    %143 = vector.shape_cast %142 : vector<1x1x14x256xf32> to vector<14x256xf32>
    %144 = vector.shape_cast %133 : vector<14x256xf32> to vector<1x1x14x256xf32>
    tpu.vector_store %arg4[%c0_39, %c0_40, %c0_41, %c0_42], %144 {strides = array<i32>} : memref<1x3x14x256xf32, #tpu.memory_space<vmem>>, vector<1x1x14x256xf32>,
    %c0_43 = arith.constant 0 : index
    %c1_44 = arith.constant 1 : index
    %c0_45 = arith.constant 0 : index
    %c0_46 = arith.constant 0 : index
    %145 = vector.load %arg4[%c0_43, %c1_44, %c0_45, %c0_46] : memref<1x3x14x256xf32, #tpu.memory_space<vmem>>, vector<1x1x14x256xf32>
    %146 = vector.shape_cast %145 : vector<1x1x14x256xf32> to vector<14x256xf32>
    %147 = vector.shape_cast %137 : vector<14x256xf32> to vector<1x1x14x256xf32>
    tpu.vector_store %arg4[%c0_43, %c1_44, %c0_45, %c0_46], %147 {strides = array<i32>} : memref<1x3x14x256xf32, #tpu.memory_space<vmem>>, vector<1x1x14x256xf32>,
    %c0_47 = arith.constant 0 : index
    %c2_48 = arith.constant 2 : index
    %c0_49 = arith.constant 0 : index
    %c0_50 = arith.constant 0 : index
    %148 = vector.load %arg4[%c0_47, %c2_48, %c0_49, %c0_50] : memref<1x3x14x256xf32, #tpu.memory_space<vmem>>, vector<1x1x14x256xf32>
    %149 = vector.shape_cast %148 : vector<1x1x14x256xf32> to vector<14x256xf32>
    %150 = vector.shape_cast %141 : vector<14x256xf32> to vector<1x1x14x256xf32>
    tpu.vector_store %arg4[%c0_47, %c2_48, %c0_49, %c0_50], %150 {strides = array<i32>} : memref<1x3x14x256xf32, #tpu.memory_space<vmem>>, vector<1x1x14x256xf32>,
    return
  }
  func.func @transform_0(%arg0: i32) -> i32 {
    %c0_i32 = arith.constant 0 : i32
    %c0_i32_0 = arith.constant 0 : i32
    return %c0_i32 : i32
  }
  func.func @transform_1(%arg0: i32) -> i32 {
    %c0_i32 = arith.constant 0 : i32
    %c0_i32_0 = arith.constant 0 : i32
    return %c0_i32 : i32
  }
  func.func @transform_2(%arg0: i32) -> (i32, i32, i32) {
    %c0_i32 = arith.constant 0 : i32
    %c0_i32_0 = arith.constant 0 : i32
    %c0_i32_1 = arith.constant 0 : i32
    return %arg0, %c0_i32, %c0_i32_0 : i32, i32, i32
  }
  func.func @transform_3(%arg0: i32) -> (i32, i32, i32, i32) {
    %c0_i32 = arith.constant 0 : i32
    %c0_i32_0 = arith.constant 0 : i32
    %c0_i32_1 = arith.constant 0 : i32
    %c0_i32_2 = arith.constant 0 : i32
    return %arg0, %c0_i32, %c0_i32_0, %c0_i32_1 : i32, i32, i32, i32
  }
}

</mosaic_0001>

<bundles_post_ra>
// kernel: tpu_custom_call.1
= control target key start
LH: loop header
LB: loop body
LE: loop exit
PB: predicated region body
PF: predicated region fallthrough
CT: control target
= control target key end

     0   :  { %8 = vsyncpa [#allocation5], 0  ;;  %s2031_s0 = inlined_call_operand.hbm [shape: f32[27], index: 0, kind: input, shape index: {}]   ;;  %s2032_s1 = inlined_call_operand.hbm [shape: f32[3], index: 1, kind: input, shape index: {}]   ;;  %s2033_s2 = inlined_call_operand.hbm [shape: f32[4,16,256], index: 2, kind: input, shape index: {}]   ;;  %s2034_s3 = inlined_call_operand.vmem [shape: f32[4,3,14,256], index: 3, kind: output, shape index: {}]  }
   0x1   :  { %9 = vsyncpa [#allocation7], 0 }
   0x2   :  { %10 = vsyncpa [#allocation4], 0 }
   0x3   :  { %12 = vsyncpa [#allocation4 + $0x1], 0  ;;  %s1177_s12 = smov 0   ;;  %s1179_s13 = smov 0  }
   0x4   :  { %s1181_s14 = smov 0   ;;  %s1183_s15 = smov 0  }
   0x5 LB: > { %s1196_s16 = sadd.s32 4294967295, %s1149_s15   ;;  %s1199_s17 = sadd.s32 1, %s1149_s15   ;;  %s1149_s15 = sphi %s1183_s15, %s2229_s15   ;;  %s1145_s14 = sphi %s1181_s14, %s2228_s14   ;;  %s1141_s13 = sphi %s1179_s13, %s2227_s13   ;;  %s1137_s12 = sphi %s1177_s12, %s2226_s12  }
   0x6   : > { %s64_s18 = ssub.s32 %s1149_s15, %s1199_s17  ;;  %s67_s19 = sadd.s32 1, %s1145_s14 }
   0x7   : > { %p65_p0 = scmp.eq.s32.totalorder %s64_s18, 0  ;;  %p74_p1 = scmp.ne.s32.totalorder %s1145_s14, %s1141_s13 }
   0x8   : > { %p75_p2 = scmp.eq.s32.totalorder %s1149_s15, 0  ;;  %p80_p3 = scmp.ne.s32.totalorder %s1141_s13, %s1137_s12 }
   0x9   : > { %s1209_s20 = scalar_select %p65_p0, %s1145_s14, %s67_s19  }
   0xa   : > { %p1211_p4 = por %p75_p2, %p74_p1  ;;  %p81_p5 = scmp.eq.s32.totalorder %s1196_s16, 0 }
   0xb   : > { %p931_p6 = scmp.ge.s32.totalorder %s1149_s15, 1  ;;  %p117_p7 = scmp.lt.s32.totalorder %s1149_s15, 5 }
   0xc   : > { %p1220_p8 = por %p81_p5, %p80_p3  ;;  %s129_s26 = sshll.u32 %s2031_s0, 4  ;;  %s130_s26 = int_to_ptr.hbm [resolvable:$true] %s129_s26 }
   0xd   : > { %p1224_p9 = pnand %p931_p6, %p117_p7  ;;  %p1006_p11 = scmp.lt.s32.totalorder %s1149_s15, 4 }
   0xe   : > { %s139_s29 = sshll.u32 %s2032_s1, 4  ;;  %s150_s4 = sand.u32 1, %s1145_s14   ;;  %s140_s29 = int_to_ptr.hbm [resolvable:$true] %s139_s29 }
   0xf   : > { %p993_p10 = pneg %p1224_p9  ;;  %p1241_p13 = pnand %p1006_p11, %p1211_p4 }
  0x10   : > { %s1151_s5 = smov [#allocation3]   ;;  %s1152_s6 = smov [#allocation6]  }
  0x11   : > { %p994_p12 = pnand %p993_p10, %p81_p5  ;;  %s935_s7 = sshll.u32 %s150_s4, 5 }
  0x12   : > { %s981_s8 = sshll.u32 %s1149_s15, 5  ;;  %s154_s18 = scalar_lea.vmem [#allocation8], %s935_s7 }
  0x13   : > { %996 = dma.hbm_to_smem (!%p994_p12), %s130_s26, 16, %s1151_s5, [#allocation5]  }
  0x14   : > { %999 = dma.hbm_to_smem (!%p994_p12), %s140_s29, 16, %s1152_s6, [#allocation7]  }
  0x15   : > { %s159_s11 = scalar_lea.hbm %s2033_s2, %s981_s8  ;;  %s162_s19 = sshll.u32 %s154_s18, 4  ;;  %s163_s19 = int_to_ptr.vmem [resolvable:$true] %s162_s19 }
  0x16   : > { %s160_s12 = sshll.u32 %s159_s11, 4  ;;  %s151_s21 = scalar_lea.sflag [#allocation4], %s150_s4  ;;  %s161_s12 = int_to_ptr.hbm [resolvable:$true] %s160_s12 }
  0x17   : > { %s1077_s24 = sshra.s32 %s161_s12, 4  ;;  %p1081_p1 = pneg %p1241_p13  ;;  %s1078_s24 = int_to_ptr.hbm [resolvable:$true] %s1077_s24 }
  0x18   : > { %s1079_s25 = scalar_lea.hbm %s1078_s24, 32  ;;  %s1084_s27 = scalar_lea.hbm %s2033_s2, 128 }
  0x19   : > { %p1080_p0 = scmp.ne.s32.totalorder %s1078_s24, %s1079_s25  ;;  %p1085_p4 = scmp.lt.s32.totalorder %s1078_s24, %s2033_s2 }
  0x1a   : > { %p1086_p6 = scmp.lt.s32.totalorder %s1084_s27, %s1079_s25 }
  0x1b   : > { %p1082_p2 = pnand %p1081_p1, %p1080_p0 }
  0x1c   : > { %p1087_p7 = por %p1086_p6, %p1085_p4 }
  0x1d   : > { %p1083_p3 = pneg %p1082_p2 }
  0x1f   : > { %p1088_p10 = pnand %p1087_p7, %p1083_p3 }
  0x21   : > { %1091 = shalt.err (!%p1088_p10)
}
  0x22   : > { %s1153_s4 = smov 256   ;;  %s1154_s5 = smov 16  }
  0x23   : > { %1003 = dma.hbm_to_vmem [thread:$0]  (!%p1241_p13), %s161_s12, 512, %s163_s19, %s151_s21, %s1153_s4, %s1153_s4, %s1154_s5  }
  0x24   : > { %174 = sbr.rel (%p1224_p9) target bundleno = 262 (0x106), region = 32 }
  0x29   : > { %1124 = dma.done.wait (%p81_p5), [#allocation5], 16  }
  0x2a   : > { %1126 = vsyncadd (%p81_p5), [#allocation5], 4294967280 }
  0x2b   : > { %1128 = dma.done.wait (%p81_p5), [#allocation7], 16  }
  0x2c   : > { %1130 = vsyncadd (%p81_p5), [#allocation7], 4294967280  ;;  %s186_s6 = sand.u32 1, %s1141_s13  }
  0x2d   : > { %s941_s30 = sshll.u32 %s186_s6, 5  ;;  %s187_s7 = scalar_lea.sflag [#allocation4], %s186_s6 }
  0x2e   : > { %s1271_s8 = scalar_lea.vmem [#allocation8], %s941_s30 }
  0x2f   : > { %1132 = dma.done.wait (%p1220_p8), %s187_s7, 512  }
  0x30   : > { %1134 = vsyncadd (%p1220_p8), %s187_s7, 4294966784 }
  0x31   : > { %196 = sfence }
  0x32   : > { %v221_v0 = vld [vmem:[%s1271_s8 + $0x8] sm:$0xff]  ;;  %v220_v1 = vld [vmem:[%s1271_s8] sm:$0xff]  ;;  %s1155_s23 = smov 127   ;;  %s1156_s9 = smov 126   ;;  %v1280_v2 = vld [vmem:[%s1271_s8 + $0x18] sm:$0xff]  ;;  %v232_v4 = vlaneseq  ;;  %vm383_vm2 = vcmask 1046528  }
  0x33   : > { %228 = vrot.lane.b32.xlu1 %v221_v0, %s1155_s23  ;;  %224 = vrot.lane.b32.xlu0 %v220_v1, %s1155_s23  ;;  %v1283_v3 = vld [vmem:[%s1271_s8 + $0x10] sm:$0xff]  ;;  %s261_s22 = sld [smem:[#allocation6]]  ;;  %v270_v19 = vld [vmem:[%s1271_s8 + $0x18] sm:$0x3f]  ;;  %vm612_vm3 = vcmask 1045504   ;;  %p215_p5 = scmp.lt.s32.totalorder %s1196_s16, 3 }
  0x34   : > { %243 = vrot.lane.b32.xlu2 %v220_v1, %s1156_s9  ;;  %s943_s10 = sld [smem:[#allocation6 + $0x1]]  ;;  %v1309_v8 = vand.u32 127, %v232_v4  ;;  %v269_v18 = vld [vmem:[%s1271_s8 + $0x10] sm:$0x3f]  ;;  %v372_v39 = vld [vmem:[%s1271_s8 + $0x18] sm:$0x7f] }
  0x35   : > { %s944_s11 = sld [smem:[#allocation6 + $0x2]]  ;;  %v371_v38 = vld [vmem:[%s1271_s8 + $0x10] sm:$0x7f]  ;;  %s2231_s16 = smov (!%p215_p5, %s1196_s16), 3 }
  0x36   : > { %s271_s12 = sld [smem:[#allocation3]]  ;;  %vm234_vm0 = vcmp.lt.s32.totalorder %v1309_v8, 127  ;;  %vm251_vm1 = vcmp.lt.s32.totalorder %v1309_v8, 126 }
  0x37   : > { %s945_s18 = sld [smem:[#allocation3 + $0x9]] }
  0x38   : > { %s946_s19 = sld [smem:[#allocation3 + $0x12]] }
  0x39   : > { %s1289_s21 = sld [smem:[#allocation3 + $0x1]]  ;;  %v262_v11 = vstv %s261_s22 }
  0x3a   : > { %s1291_s24 = sld [smem:[#allocation3 + $0xa]]  ;;  %v264_v15 = vstv %s943_s10 }
  0x3b   : > { %230 = vrot.lane.b32.xlu1 %v1280_v2, %s1155_s23  ;;  %226 = vrot.lane.b32.xlu0 %v1283_v3, %s1155_s23  ;;  %s1293_s25 = sld [smem:[#allocation3 + $0x13]]  ;;  %v266_v16 = vstv %s944_s11 }
  0x3c   : > { %245 = vrot.lane.b32.xlu2 %v1283_v3, %s1156_s9  ;;  %s1295_s26 = sld [smem:[#allocation3 + $0x4]]  ;;  %v272_v5 = vstv %s271_s12 }
  0x3d   : > { %s1297_s15 = sld [smem:[#allocation3 + $0xd]]  ;;  %v282_v6 = vstv %s945_s18  ;;  %v273_v9 = vmul.f32 %v272_v5, %v220_v1  ;;  %v274_v10 = vmul.f32 %v272_v5, %v221_v0  ;;  %v275_v27 = vmul.f32 %v272_v5, %v269_v18 }
  0x3e   : > { %s1299_s27 = sld [smem:[#allocation3 + $0x16]]  ;;  %v292_v7 = vstv %s946_s19  ;;  %v283_v12 = vmul.f32 %v282_v6, %v220_v1  ;;  %v284_v13 = vmul.f32 %v282_v6, %v221_v0  ;;  %v276_v30 = vmul.f32 %v272_v5, %v270_v19 }
  0x3f   : > { %s1301_s28 = sld [smem:[#allocation3 + $0x7]]  ;;  %v293_v14 = vmul.f32 %v292_v7, %v220_v1  ;;  %v294_v17 = vmul.f32 %v292_v7, %v221_v0  ;;  %v1324_v20 = vadd.f32 %v273_v9, %v262_v11  ;;  %v1326_v21 = vadd.f32 %v274_v10, %v262_v11 }
  0x40   : > { %s1303_s29 = sld [smem:[#allocation3 + $0x10]]  ;;  %v1329_v22 = vstv %s1289_s21  ;;  %v1332_v23 = vstv %s1291_s24  ;;  %v1336_v24 = vadd.f32 %v283_v12, %v264_v15  ;;  %v1338_v25 = vadd.f32 %v284_v13, %v264_v15 }
  0x41   : > { %s1305_s4 = sld [smem:[#allocation3 + $0x19]]  ;;  %v1340_v26 = vadd.f32 %v293_v14, %v266_v16  ;;  %v1344_v28 = vadd.f32 %v294_v17, %v266_v16  ;;  %v1347_v29 = vstv %s1293_s25  ;;  %v285_v31 = vmul.f32 %v282_v6, %v269_v18 }
  0x42   : > { %s1307_s5 = sld [smem:[#allocation3 + $0x2]]  ;;  %v1352_v32 = vstv %s1295_s26  ;;  %v286_v36 = vmul.f32 %v282_v6, %v270_v19  ;;  %v295_v37 = vmul.f32 %v292_v7, %v269_v18  ;;  %v1377_v46 = vadd.f32 %v275_v27, %v262_v11  ;;  %v1535_v6 = vld [vmem:[%s1271_s8 + $0x8] sm:$0xfe]  ;;  %s982_s26 = smul.u32 96, %s2231_s16 }
  0x43   : > { %249 = vrot.lane.b32.xlu1 %v1280_v2, %s1156_s9  ;;  %247 = vrot.lane.b32.xlu0 %v221_v0, %s1156_s9  ;;  %s1311_s6 = sld [smem:[#allocation3 + $0x3]]  ;;  %v1355_v33 = vstv %s1297_s15  ;;  %v296_v47 = vmul.f32 %v292_v7, %v270_v19  ;;  %v1385_v50 = vadd.f32 %v276_v30, %v262_v11  ;;  %v1387_v51 = vadd.f32 %v285_v31, %v264_v15 }
  0x44   : > { %s1313_s30 = sld [smem:[#allocation3 + $0xc]]  ;;  %v1358_v34 = vstv %s1299_s27  ;;  %v1405_v56 = vadd.f32 %v286_v36, %v264_v15  ;;  %v1407_v57 = vadd.f32 %v295_v37, %v266_v16  ;;  %2112 = vst [vmem:[#allocation34_spill] sm:$0xff] %v1535_v6  ;;  %s1852_s27 = scalar_lea.vmem %s2034_s3, %s982_s26 }
  0x45   : > { %s1315_s7 = sld [smem:[#allocation3 + $0xb]]  ;;  %v1361_v35 = vstv %s1301_s28  ;;  %v1415_v60 = vadd.f32 %v296_v47, %v266_v16 }
  0x46   : > { %s1318_s23 = sld [smem:[#allocation3 + $0x14]]  ;;  %v1372_v43 = vstv %s1303_s29 }
  0x47   : > { %s1322_s9 = sld [smem:[#allocation3 + $0x15]]  ;;  %v1375_v44 = vstv %s1305_s4 }
  0x48   : > { %s1334_s22 = sld [smem:[#allocation3 + $0x6]]  ;;  %v1418_v61 = vstv %s1307_s5 }
  0x49   : > { %s1342_s10 = sld [smem:[#allocation3 + $0x5]]  ;;  %v1366_v40 = vstv %s1311_s6 }
  0x4a   : > { %s1349_s11 = sld [smem:[#allocation3 + $0xe]]  ;;  %v1369_v41 = vstv %s1313_s30  ;;  %v1392_v52 = vmul.f32 %v1366_v40, %v371_v38  ;;  %v1395_v53 = vmul.f32 %v1366_v40, %v372_v39 }
  0x4b   : > { %s1379_s12 = sld [smem:[#allocation3 + $0xf]]  ;;  %v1398_v54 = vmul.f32 %v1369_v41, %v371_v38  ;;  %v1410_v58 = vmul.f32 %v1369_v41, %v372_v39  ;;  %v1421_v62 = vstv %s1315_s7 }
  0x4c   : > { %s1389_s18 = sld [smem:[#allocation3 + $0x18]]  ;;  %v1424_v63 = vstv %s1318_s23 }
  0x4d   : > { %v1401_v55 = vstv %s1322_s9  ;;  %s1403_s19 = sld [smem:[#allocation3 + $0x17]] }
  0x4e   : > { %2090 = vst [vmem:[#allocation12_spill] sm:$0xff] %v1401_v55  ;;  %v1413_v59 = vstv %s1334_s22  ;;  %s1426_s21 = sld [smem:[#allocation3 + $0x8]]  ;;  %v1429_v0 = vmul.f32 %v1401_v55, %v371_v38  ;;  %v1432_v1 = vmul.f32 %v1401_v55, %v372_v39 }
  0x4f   : > { %2091 = vst [vmem:[#allocation13_spill] sm:$0xff] %v1413_v59  ;;  %v1435_v4 = vstv %s1342_s10  ;;  %s1440_s24 = sld [smem:[#allocation3 + $0x11]]  ;;  %v1447_v10 = vmul.f32 %v1413_v59, %v1283_v3  ;;  %v1456_v14 = vmul.f32 %v1413_v59, %v1280_v2 }
  0x50   : > { %2092 = vst [vmem:[#allocation14_spill] sm:$0xff] %v1432_v1  ;;  %v1438_v5 = vstv %s1349_s11  ;;  %s1449_s25 = sld [smem:[#allocation3 + $0x1a]] }
  0x51   : > { %2093 = vst [vmem:[#allocation15_spill] sm:$0xff] %v1435_v4  ;;  %v1462_v27 = vstv %s1379_s12 }
  0x52   : > { %2094 = vst [vmem:[#allocation16_spill] sm:$0xff] %v1447_v10  ;;  %v1474_v37 = vstv %s1389_s18 }
  0x53   : > { %2095 = vst [vmem:[#allocation17_spill] sm:$0xff] %v1456_v14 }
  0x54   : > { %2096 = vst [vmem:[#allocation18_spill] sm:$0xff] %v1462_v27  ;;  %v1523_v38 = vstv %s1426_s21 }
  0x55   : > { %2097 = vst [vmem:[#allocation19_spill] sm:$0xff] %v1474_v37  ;;  %v1529_v7 = vstv %s1440_s24 }
  0x56   : > { %2109 = vst [vmem:[#allocation31_spill] sm:$0xff] %v1523_v38 }
  0x57   : > { %2110 = vst [vmem:[#allocation32_spill] sm:$0xff] %v1529_v7 }
  0xa5   : > { %v229_v42 = vpop.permute.xlu1 %228  ;;  %v225_v45 = vpop.permute.xlu0 %224 }
  0xa6   : > { %v235_v48 = vsel %vm234_vm0, %v225_v45, %v229_v42  ;;  %v237_v49 = vsel %vm234_vm0, %v229_v42, %v225_v45  ;;  %v1480_v42 = vstv %s1403_s19  ;;  %v1496_v45 = vld [vmem:[%s1271_s8] sm:$0xfe] }
  0xa7   : > { %239 = vst [vmem:[#allocation2 + $0x30] sm:$0xff] %v235_v48  ;;  %v307_v11 = vmul.f32 %v1329_v22, %v235_v48  ;;  %v308_v12 = vmul.f32 %v1329_v22, %v237_v49  ;;  %v317_v15 = vmul.f32 %v1332_v23, %v235_v48  ;;  %v318_v16 = vmul.f32 %v1332_v23, %v237_v49 }
  0xa8   : > { %240 = vst [vmem:[#allocation2] sm:$0xff] %v237_v49  ;;  %v327_v17 = vmul.f32 %v1347_v29, %v235_v48  ;;  %v328_v30 = vmul.f32 %v1347_v29, %v237_v49 }
  0xa9   : > { %2098 = vst [vmem:[#allocation20_spill] sm:$0xff] %v1480_v42  ;;  %v1484_v47 = vadd.f32 %v307_v11, %v1324_v20  ;;  %v1487_v48 = vadd.f32 %v308_v12, %v1326_v21  ;;  %v1499_v20 = vadd.f32 %v317_v15, %v1336_v24  ;;  %v1503_v21 = vmul.f32 %v1462_v27, %v1280_v2 }
  0xaa   : > { %v1507_v12 = vmul.f32 %v1474_v37, %v1283_v3  ;;  %v1514_v39 = vadd.f32 %v318_v16, %v1338_v25  ;;  %v1517_v13 = vadd.f32 %v327_v17, %v1340_v26  ;;  %v1520_v24 = vadd.f32 %v328_v30, %v1344_v28  ;;  %v1550_v17 = vpop.permute.xlu2 %243 }
  0xab   : > { %2099 = vst [vmem:[#allocation21_spill] sm:$0xff] %v1484_v47  ;;  %v1539_v25 = vmul.f32 %v1366_v40, %v1496_v45  ;;  %v1571_v30 = vmul.f32 %v1366_v40, %v1535_v6 }
  0xac   : > { %2100 = vst [vmem:[#allocation22_spill] sm:$0xff] %v1487_v48 }
  0xad   : > { %v231_v18 = vpop.permute.xlu1 %230  ;;  %v227_v19 = vpop.permute.xlu0 %226  ;;  %2102 = vst [vmem:[#allocation24_spill] sm:$0xff] %v1499_v20 }
  0xae   : > { %v1467_v31 = vsel %vm234_vm0, %v227_v19, %v231_v18  ;;  %v1471_v36 = vsel %vm234_vm0, %v231_v18, %v227_v19  ;;  %v446_v49 = vld [vmem:[#allocation2 + $0x30] sm:$0xfe]  ;;  %v1493_v19 = vmul.f32 %v1462_v27, %v1283_v3  ;;  %2103 = vst [vmem:[#allocation25_spill] sm:$0xff] %v1503_v21  ;;  %v1511_v18 = vmul.f32 %v1474_v37, %v1280_v2 }
  0xaf   : > { %241 = vst [vmem:[#allocation2 + $0x18] sm:$0xff] %v1467_v31  ;;  %v675_v11 = vld [vmem:[#allocation2 + $0x30] sm:$0xfc]  ;;  %v447_v15 = vld [vmem:[#allocation2] sm:$0xfe]  ;;  %v1526_v9 = vmul.f32 %v1352_v32, %v446_v49  ;;  %v1532_v2 = vstv %s1449_s25  ;;  %v1542_v26 = vmul.f32 %v1355_v33, %v446_v49  ;;  %v1545_v28 = vmul.f32 %v1358_v34, %v446_v49 }
  0xb0   : > { %242 = vst [vmem:[#allocation2 + $0x10] sm:$0xff] %v1471_v36  ;;  %v676_v3 = vld [vmem:[#allocation2] sm:$0xfc]  ;;  %v1548_v16 = vmul.f32 %v1361_v35, %v675_v11  ;;  %v1560_v48 = vmul.f32 %v1355_v33, %v447_v15  ;;  %v1563_v49 = vmul.f32 %v1358_v34, %v447_v15  ;;  %v1585_v59 = vmul.f32 %v1375_v44, %v675_v11 }
  0xb1   : > { %2101 = vst [vmem:[#allocation23_spill] sm:$0xff] %v1493_v19  ;;  %v1566_v47 = vmul.f32 %v1361_v35, %v676_v3  ;;  %v1578_v20 = vmul.f32 %v1372_v43, %v676_v3  ;;  %v1647_v19 = vmul.f32 %v1375_v44, %v1471_v36 }
  0xb2   : > { %2104 = vst [vmem:[#allocation26_spill] sm:$0xff] %v1507_v12 }
  0xb3   : > { %2105 = vst [vmem:[#allocation27_spill] sm:$0xff] %v1511_v18  ;;  %v1589_v18 = vmul.f32 %v1375_v44, %v676_v3  ;;  %v1604_v3 = vmul.f32 %v1372_v43, %v1467_v31 }
  0xb4   : > { %2106 = vst [vmem:[#allocation28_spill] sm:$0xff] %v1514_v39  ;;  %v1575_v39 = vmul.f32 %v1372_v43, %v675_v11  ;;  %v487_v11 = vrot.slane %v1560_v48, 1 }
  0xb5   : > { %2107 = vst [vmem:[#allocation29_spill] sm:$0xff] %v1517_v13  ;;  %v460_v13 = vrot.slane %v1526_v9, 1  ;;  %v250_v42 = vpop.permute.xlu1 %249 }
  0xb6   : > { %2108 = vst [vmem:[#allocation30_spill] sm:$0xff] %v1520_v24  ;;  %v1554_v24 = vmul.f32 %v1352_v32, %v447_v15  ;;  %v448_v40 = vld [vmem:[#allocation2 + $0x18] sm:$0x7f]  ;;  %v1593_v15 = vmul.f32 %v1361_v35, %v1467_v31  ;;  %v713_v37 = vrot.slane %v1575_v39, 2 }
  0xb7   : > { %2111 = vst [vmem:[#allocation33_spill] sm:$0xff] %v1532_v2  ;;  %v303_v12 = vld [vmem:[#allocation2 + $0x18] sm:$0x3f]  ;;  %v449_v55 = vld [vmem:[#allocation2 + $0x10] sm:$0x7f]  ;;  %v1609_v14 = vmul.f32 %v1352_v32, %v448_v40 }
  0xb8   : > { %2113 = vst [vmem:[#allocation35_spill] sm:$0xff] %v1550_v17  ;;  %v689_v17 = vrot.slane %v1548_v16, 2  ;;  %v463_v9 = vrot.slane %v1554_v24, 1  ;;  %v1597_v16 = vmul.f32 %v1361_v35, %v1471_v36  ;;  %v692_v24 = vrot.slane %v1566_v47, 2  ;;  %v304_v21 = vld [vmem:[#allocation2 + $0x10] sm:$0x3f] }
  0xb9   : > { %2114 = vst [vmem:[#allocation36_spill] sm:$0xff] %v1563_v49  ;;  %v1613_v35 = vmul.f32 %v1372_v43, %v1471_v36  ;;  %v309_v47 = vmul.f32 %v1329_v22, %v303_v12  ;;  %v319_v27 = vmul.f32 %v1332_v23, %v303_v12  ;;  %v1619_v49 = vmul.f32 %v1352_v32, %v449_v55  ;;  %v246_v32 = vpop.permute.xlu2 %245 }
  0xba   : > { %2115 = vst [vmem:[#allocation37_spill] sm:$0xff] %v1578_v20  ;;  %v329_v6 = vmul.f32 %v1347_v29, %v303_v12  ;;  %v310_v43 = vmul.f32 %v1329_v22, %v304_v21  ;;  %v320_v10 = vmul.f32 %v1332_v23, %v304_v21  ;;  %v330_v48 = vmul.f32 %v1347_v29, %v304_v21 }
  0xbb   : > { %2116 = vst [vmem:[#allocation38_spill] sm:$0xff] %v1585_v59  ;;  %v1629_v59 = vmul.f32 %v1355_v33, %v448_v40  ;;  %v2067_v1 = vrot.slane %v1609_v14, 1  ;;  %v1633_v39 = vmul.f32 %v1355_v33, %v449_v55  ;;  %v1636_v12 = vmul.f32 %v1358_v34, %v448_v40 }
  0xbc   : > { %v1640_v22 = vmul.f32 %v1375_v44, %v1467_v31  ;;  %v313_v23 = vadd.f32 %v309_v47, %v1377_v46  ;;  %v323_v29 = vadd.f32 %v319_v27, %v1387_v51  ;;  %v2066_v21 = vrot.slane %v1619_v49, 1 }
  0xbd   : > { %v333_v33 = vadd.f32 %v329_v6, %v1407_v57  ;;  %v1651_v20 = vmul.f32 %v1358_v34, %v449_v55  ;;  %v253_v40 = vsel %vm251_vm1, %v246_v32, %v250_v42  ;;  %v255_v31 = vsel %vm251_vm1, %v250_v42, %v246_v32 }
  0xbe   : > { %v314_v46 = vadd.f32 %v310_v43, %v1385_v50  ;;  %v324_v51 = vadd.f32 %v320_v10, %v1405_v56  ;;  %v334_v27 = vadd.f32 %v330_v48, %v1415_v60  ;;  %v485_v44 = vrot.slane %v1629_v59, 1  ;;  %259 = vst [vmem:[#allocation2 + $0x28] sm:$0xff] %v253_v40 }
  0xbf   : > { %v1664_v34 = vsel %vm383_vm2, %v460_v13, %v2067_v1  ;;  %v2065_v55 = vrot.slane %v1633_v39, 1  ;;  %v509_v57 = vrot.slane %v1636_v12, 1  ;;  %v2064_v6 = vrot.slane %v1604_v3, 2  ;;  %260 = vst [vmem:[#allocation2 + $0x38] sm:$0xff] %v255_v31 }
  0xc0   : > { %v1672_v50 = vsel %vm383_vm2, %v463_v9, %v2066_v21  ;;  %v2117_v56 = vrot.slane %v1593_v15, 2  ;;  %v2119_v60 = vrot.slane %v1597_v16, 2  ;;  %v1685_v13 = vmul.f32 %v1523_v38, %v253_v40 }
  0xc1   : > { %v1689_v42 = vmul.f32 %v1523_v38, %v255_v31  ;;  %v1692_v9 = vmul.f32 %v1529_v7, %v253_v40  ;;  %v387_v48 = vrot.slane %v1571_v30, 1  ;;  %v1706_v12 = vsel %vm383_vm2, %v487_v11, %v2065_v55 }
  0xc2   : > { %v1677_v59 = vsel %vm612_vm3, %v689_v17, %v2117_v56  ;;  %v1682_v10 = vsel %vm612_vm3, %v692_v24, %v2119_v60  ;;  %v2121_v17 = vrot.slane %v1542_v26, 1  ;;  %2123 = vst [vmem:[#allocation42_spill] sm:$0xff] %v1706_v12  ;;  %v2124_v56 = vrot.slane %v1545_v28, 1 }
  0xc3   : > { %2118 = vst [vmem:[#allocation39_spill] sm:$0xff] %v1677_v59  ;;  %v1716_v26 = vsel %vm612_vm3, %v713_v37, %v2064_v6  ;;  %v2127_v60 = vrot.slane %v1392_v52, 1  ;;  %v1727_v43 = vmul.f32 %v1529_v7, %v255_v31  ;;  %v1730_v28 = vmul.f32 %v1532_v2, %v253_v40 }
  0xc4   : > { %2120 = vst [vmem:[#allocation40_spill] sm:$0xff] %v1682_v10  ;;  %v1698_v47 = vsel %vm383_vm2, %v2121_v17, %v485_v44  ;;  %v1711_v30 = vsel %vm383_vm2, %v2124_v56, %v509_v57  ;;  %v2128_v17 = vrot.slane %v1539_v25, 1  ;;  %v1733_v56 = vmul.f32 %v1532_v2, %v255_v31 }
  0xc5   : > { %2122 = vst [vmem:[#allocation41_spill] sm:$0xff] %v1698_v47  ;;  %v337_v37 = vld [vmem:[#allocation2 + $0x28] sm:$0x3f]  ;;  %v1744_v11 = vmul.f32 %v1369_v41, %v1496_v45  ;;  %v2133_v12 = vrot.slane %v1392_v52, 1 }
  0xc6   : > { %2125 = vst [vmem:[#allocation43_spill] sm:$0xff] %v1711_v30  ;;  %v1723_v32 = vsel %vm383_vm2, %v2128_v17, %v2127_v60  ;;  %v524_v24 = vld [vmem:[#allocation2 + $0x28] sm:$0x7f]  ;;  %v2132_v60 = vrot.slane %v1395_v53, 1  ;;  %v338_v40 = vld [vmem:[#allocation2 + $0x38] sm:$0x3f]  ;;  %v343_v31 = vmul.f32 %v1418_v61, %v337_v37  ;;  %v353_v36 = vmul.f32 %v1421_v62, %v337_v37 }
  0xc7   : > { %2126 = vst [vmem:[#allocation44_spill] sm:$0xff] %v1716_v26  ;;  %v363_v55 = vmul.f32 %v1424_v63, %v337_v37  ;;  %v525_v6 = vld [vmem:[#allocation2 + $0x38] sm:$0x7f]  ;;  %v1750_v25 = vmul.f32 %v1435_v4, %v524_v24  ;;  %v344_v21 = vmul.f32 %v1418_v61, %v338_v40 }
  0xc8   : > { %2129 = vst [vmem:[#allocation45_spill] sm:$0xff] %v1727_v43  ;;  %v1740_v17 = vsel %vm383_vm2, %v387_v48, %v2132_v60  ;;  %v354_v48 = vmul.f32 %v1421_v62, %v338_v40  ;;  %v364_v60 = vmul.f32 %v1424_v63, %v338_v40  ;;  %v1756_v1 = vmul.f32 %v1435_v4, %v525_v6 }
  0xc9   : > { %2130 = vst [vmem:[#allocation46_spill] sm:$0xff] %v1730_v28  ;;  %v347_v2 = vadd.f32 %v343_v31, %v313_v23  ;;  %v357_v10 = vadd.f32 %v353_v36, %v323_v29  ;;  %v367_v26 = vadd.f32 %v363_v55, %v333_v33  ;;  %v2079_v59 = vrot.slane %v1750_v25, 1  ;;  %v2138_v55 = vld [vmem:[#allocation14_spill] sm:$0xff] }
  0xca   : > { %2131 = vst [vmem:[#allocation47_spill] sm:$0xff] %v1733_v56  ;;  %v348_v37 = vadd.f32 %v344_v21, %v314_v46  ;;  %v358_v7 = vadd.f32 %v354_v48, %v324_v51  ;;  %v368_v30 = vadd.f32 %v364_v60, %v334_v27  ;;  %v2077_v38 = vrot.slane %v1756_v1, 1 }
  0xcb   : > { %v396_v47 = vadd.f32 %v2133_v12, %v347_v2  ;;  %v2134_v40 = vrot.slane %v1398_v54, 1  ;;  %v2135_v23 = vrot.slane %v1429_v0, 1  ;;  %v1768_v33 = vmul.f32 %v1438_v5, %v524_v24 }
  0xcc   : > { %v2136_v21 = vrot.slane %v1395_v53, 1  ;;  %v2137_v51 = vrot.slane %v1410_v58, 1  ;;  %v2139_v36 = vrot.slane %v2138_v55, 1  ;;  %v1777_v52 = vmul.f32 %v1438_v5, %v525_v6 }
  0xcd   : > { %v420_v4 = vadd.f32 %v2134_v40, %v357_v10  ;;  %v444_v29 = vadd.f32 %v2135_v23, %v367_v26  ;;  %v2140_v2 = vrot.slane %v1609_v14, 1  ;;  %v2078_v48 = vrot.slane %v1768_v33, 1 }
  0xce   : > { %v397_v46 = vadd.f32 %v2136_v21, %v348_v37  ;;  %v421_v27 = vadd.f32 %v2137_v51, %v358_v7  ;;  %v445_v31 = vadd.f32 %v2139_v36, %v368_v30  ;;  %v2141_v53 = vrot.slane %v1619_v49, 1  ;;  %v248_v21 = vpop.permute.xlu0 %247 }
  0xcf   : > { %v472_v10 = vadd.f32 %v2140_v2, %v396_v47  ;;  %v496_v12 = vadd.f32 %v485_v44, %v420_v4  ;;  %v520_v26 = vadd.f32 %v509_v57, %v444_v29  ;;  %v2142_v7 = vrot.slane %v1633_v39, 1  ;;  %v2144_v57 = vld [vmem:[#allocation20_spill] sm:$0xff] }
  0xd0   : > { %v473_v60 = vadd.f32 %v2141_v53, %v397_v46  ;;  %v2143_v37 = vrot.slane %v1651_v20, 1  ;;  %v2076_v14 = vrot.slane %v1777_v52, 1  ;;  %v1799_v47 = vmul.f32 %v2144_v57, %v524_v24  ;;  %v2145_v24 = vld [vmem:[#allocation16_spill] sm:$0xff] }
  0xd1   : > { %v497_v30 = vadd.f32 %v2142_v7, %v421_v27  ;;  %v548_v4 = vadd.f32 %v2079_v59, %v472_v10  ;;  %v572_v44 = vadd.f32 %v2078_v48, %v496_v12  ;;  %v1802_v49 = vmul.f32 %v2144_v57, %v525_v6  ;;  %v2147_v6 = vld [vmem:[#allocation23_spill] sm:$0xff]  ;;  %v2149_v10 = vld [vmem:[#allocation17_spill] sm:$0xff] }
  0xd2   : > { %v521_v40 = vadd.f32 %v2143_v37, %v445_v31  ;;  %v549_v39 = vadd.f32 %v2077_v38, %v473_v60  ;;  %v2082_v29 = vrot.slane %v1727_v43, 2  ;;  %v2080_v46 = vrot.slane %v1799_v47, 1  ;;  %v2151_v60 = vld [vmem:[#allocation25_spill] sm:$0xff] }
  0xd3   : > { %v573_v23 = vadd.f32 %v2076_v14, %v497_v30  ;;  %v2081_v51 = vrot.slane %v1802_v49, 1  ;;  %v2146_v27 = vrot.slane %v2145_v24, 2  ;;  %v2148_v31 = vrot.slane %v2147_v6, 2  ;;  %v2153_v14 = vld [vmem:[#allocation34_spill] sm:$0xff] }
  0xd4   : > { %v2150_v12 = vrot.slane %v2149_v10, 2  ;;  %v2152_v7 = vrot.slane %v2151_v60, 2  ;;  %v401_v38 = vmul.f32 %v1369_v41, %v2153_v14  ;;  %v596_v48 = vadd.f32 %v2080_v46, %v520_v26  ;;  %v2158_v26 = vld [vmem:[#allocation12_spill] sm:$0xff] }
  0xd5   : > { %v625_v36 = vadd.f32 %v2146_v27, %v548_v4  ;;  %v649_v2 = vadd.f32 %v2148_v31, %v572_v44  ;;  %v597_v4 = vadd.f32 %v2081_v51, %v521_v40  ;;  %v2154_v44 = vrot.slane %v1593_v15, 2  ;;  %v2159_v40 = vld [vmem:[#allocation26_spill] sm:$0xff] }
  0xd6   : > { %v626_v53 = vadd.f32 %v2150_v12, %v549_v39  ;;  %v650_v30 = vadd.f32 %v2152_v7, %v573_v23  ;;  %v2155_v39 = vrot.slane %v1604_v3, 2  ;;  %v598_v12 = vld [vmem:[%s1271_s8] sm:$0xfc]  ;;  %v2156_v23 = vrot.slane %v1597_v16, 2 }
  0xd7   : > { %v701_v27 = vadd.f32 %v2154_v44, %v625_v36  ;;  %v2157_v59 = vrot.slane %v1613_v35, 2  ;;  %v408_v41 = vrot.slane %v1744_v11, 1  ;;  %v424_v46 = vmul.f32 %v2158_v26, %v1496_v45  ;;  %v2161_v36 = vld [vmem:[#allocation27_spill] sm:$0xff] }
  0xd8   : > { %v725_v31 = vadd.f32 %v2155_v39, %v649_v2  ;;  %v702_v7 = vadd.f32 %v2156_v23, %v626_v53  ;;  %v2160_v51 = vrot.slane %v2159_v40, 2  ;;  %v2162_v44 = vrot.slane %v2161_v36, 2  ;;  %v599_v23 = vld [vmem:[%s1271_s8 + $0x8] sm:$0xfc] }
  0xd9   : > { %v726_v37 = vadd.f32 %v2157_v59, %v650_v30  ;;  %v2163_v2 = vrot.slane %v1685_v13, 2  ;;  %v2164_v16 = vrot.slane %v1692_v9, 2  ;;  %v2165_v45 = vrot.slane %v1689_v42, 2 }
  0xda   : > { %v673_v15 = vadd.f32 %v2160_v51, %v596_v48  ;;  %v674_v3 = vadd.f32 %v2162_v44, %v597_v4  ;;  %v425_v48 = vmul.f32 %v2158_v26, %v2153_v14  ;;  %v2166_v51 = vld [vmem:[#allocation13_spill] sm:$0xff]  ;;  %v2167_v4 = vrot.slane %v1640_v22, 2 }
  0xdb   : > { %v777_v39 = vadd.f32 %v2163_v2, %v701_v27  ;;  %v801_v53 = vadd.f32 %v2164_v16, %v725_v31  ;;  %v778_v59 = vadd.f32 %v2165_v45, %v702_v7  ;;  %v802_v11 = vadd.f32 %v2082_v29, %v726_v37  ;;  %v2169_v2 = vld [vmem:[#allocation35_spill] sm:$0xff] }
  0xdc   : > { %v604_v30 = vmul.f32 %v2166_v51, %v598_v12  ;;  %v749_v27 = vadd.f32 %v2167_v4, %v673_v15  ;;  %v2168_v31 = vrot.slane %v1647_v19, 2  ;;  %v252_v7 = vsel %vm251_vm1, %v2169_v2, %v248_v21  ;;  %v2173_v29 = vld [vmem:[#allocation19_spill] sm:$0xff] }
  0xdd   : > { %829 = vst [vmem:[%s1852_s27 + $0x10] sm:$0x3f] %v777_v39  ;;  %v254_v37 = vsel %vm251_vm1, %v248_v21, %v2169_v2  ;;  %v411_v14 = vrot.slane %v401_v38, 1  ;;  %v605_v26 = vmul.f32 %v2166_v51, %v599_v23  ;;  %v341_v16 = vmul.f32 %v1418_v61, %v252_v7 }
  0xde   : > { %v750_v44 = vadd.f32 %v2168_v31, %v674_v3  ;;  %830 = vst [vmem:[%s1852_s27 + $0x18] sm:$0x3f] %v778_v59  ;;  %v342_v15 = vmul.f32 %v1418_v61, %v254_v37  ;;  %v2170_v3 = vrot.slane %v1730_v28, 2  ;;  %v2171_v45 = vrot.slane %v1733_v56, 2  ;;  %v2172_v59 = vld [vmem:[#allocation18_spill] sm:$0xff]  ;;  %v2177_v28 = vld [vmem:[#allocation28_spill] sm:$0xff] }
  0xdf   : > { %973 = vst [vmem:[%s1852_s27 + $0x30] sm:$0x3f] %v801_v53  ;;  %v351_v8 = vmul.f32 %v1421_v62, %v252_v7  ;;  %v352_v21 = vmul.f32 %v1421_v62, %v254_v37  ;;  %v432_v38 = vrot.slane %v424_v46, 1  ;;  %v629_v51 = vmul.f32 %v2172_v59, %v598_v12  ;;  %v2175_v62 = vld [vmem:[#allocation22_spill] sm:$0xff]  ;;  %v2176_v46 = vld [vmem:[#allocation24_spill] sm:$0xff] }
  0xe0   : > { %v825_v39 = vadd.f32 %v2170_v3, %v749_v27  ;;  %v826_v4 = vadd.f32 %v2171_v45, %v750_v44  ;;  %974 = vst [vmem:[%s1852_s27 + $0x38] sm:$0x3f] %v802_v11  ;;  %v630_v31 = vmul.f32 %v2172_v59, %v599_v23  ;;  %v361_v61 = vmul.f32 %v1424_v63, %v252_v7  ;;  %v2174_v44 = vld [vmem:[#allocation21_spill] sm:$0xff] }
  0xe1   : > { %v435_v2 = vrot.slane %v425_v48, 1  ;;  %v653_v27 = vmul.f32 %v2173_v29, %v598_v12  ;;  %v654_v3 = vmul.f32 %v2173_v29, %v599_v23  ;;  %v362_v53 = vmul.f32 %v1424_v63, %v254_v37  ;;  %257 = vst [vmem:[#allocation2 + $0x8] sm:$0xff] %v252_v7 }
  0xe2   : > { %977 = vst [vmem:[%s1852_s27 + $0x50] sm:$0x3f] %v825_v39  ;;  %v345_v45 = vadd.f32 %v341_v16, %v2174_v44  ;;  %v346_v11 = vadd.f32 %v342_v15, %v2175_v62  ;;  %v355_v56 = vadd.f32 %v351_v8, %v2176_v46  ;;  %v356_v43 = vadd.f32 %v352_v21, %v2177_v28  ;;  %v2181_v8 = vld [vmem:[#allocation29_spill] sm:$0xff]  ;;  %v2183_v44 = vld [vmem:[#allocation30_spill] sm:$0xff] }
  0xe3   : > { %978 = vst [vmem:[%s1852_s27 + $0x58] sm:$0x3f] %v826_v4  ;;  %v2178_v59 = vrot.slane %v1398_v54, 1  ;;  %v2179_v48 = vrot.slane %v1410_v58, 1  ;;  %v613_v29 = vrot.slane %v604_v30, 2  ;;  %v616_v23 = vrot.slane %v605_v26, 2 }
  0xe4   : > { %v2180_v63 = vrot.slane %v1429_v0, 1  ;;  %v637_v15 = vrot.slane %v629_v51, 2  ;;  %v640_v4 = vrot.slane %v630_v31, 2  ;;  %258 = vst [vmem:[#allocation2 + $0x20] sm:$0xff] %v254_v37  ;;  %v365_v28 = vadd.f32 %v361_v61, %v2181_v8  ;;  %v2185_v51 = vld [vmem:[#allocation36_spill] sm:$0xff]  ;;  %v2188_v61 = vld [vmem:[#allocation37_spill] sm:$0xff] }
  0xe5   : > { %v410_v39 = vsel %vm383_vm2, %v408_v41, %v2178_v59  ;;  %v413_v12 = vsel %vm383_vm2, %v411_v14, %v2179_v48  ;;  %v2182_v54 = vrot.slane %v2138_v55, 1  ;;  %v661_v21 = vrot.slane %v653_v27, 2 }
  0xe6   : > { %v434_v16 = vsel %vm383_vm2, %v432_v38, %v2180_v63  ;;  %v664_v58 = vrot.slane %v654_v3, 2  ;;  %v366_v14 = vadd.f32 %v362_v53, %v2183_v44  ;;  %v394_v30 = vadd.f32 %v1723_v32, %v345_v45  ;;  %v2191_v53 = vld [vmem:[#allocation38_spill] sm:$0xff]  ;;  %v2205_v44 = vld [vmem:[#allocation43_spill] sm:$0xff] }
  0xe7   : > { %v437_v41 = vsel %vm383_vm2, %v435_v2, %v2182_v54  ;;  %v395_v7 = vadd.f32 %v1740_v17, %v346_v11  ;;  %v418_v0 = vadd.f32 %v410_v39, %v355_v56  ;;  %v419_v26 = vadd.f32 %v413_v12, %v356_v43 }
  0xe8   : > { %v2184_v38 = vrot.slane %v1651_v20, 1  ;;  %v2186_v37 = vrot.slane %v2185_v51, 1  ;;  %v2187_v55 = vrot.slane %v1613_v35, 2  ;;  %v2189_v2 = vrot.slane %v2188_v61, 2  ;;  %v751_v8 = vld [vmem:[#allocation2 + $0x8] sm:$0xfc] }
  0xe9   : > { %v2190_v3 = vrot.slane %v1640_v22, 2  ;;  %v2192_v32 = vrot.slane %v2191_v53, 2  ;;  %v2193_v43 = vrot.slane %v1647_v19, 2  ;;  %v2194_v20 = vrot.slane %v1589_v18, 2 }
  0xea   : > { %v513_v31 = vsel %vm383_vm2, %v2186_v37, %v2184_v38  ;;  %v718_v27 = vsel %vm612_vm3, %v2189_v2, %v2187_v55  ;;  %v2195_v35 = vrot.slane %v2145_v24, 2  ;;  %v2196_v62 = vrot.slane %v2149_v10, 2 }
  0xeb   : > { %v1927_v17 = vsel %vm612_vm3, %v2192_v32, %v2190_v3  ;;  %v1934_v56 = vsel %vm612_vm3, %v2194_v20, %v2193_v43  ;;  %v2197_v11 = vrot.slane %v2147_v6, 2  ;;  %v442_v59 = vadd.f32 %v434_v16, %v365_v28  ;;  %v2202_v16 = vld [vmem:[#allocation42_spill] sm:$0xff]  ;;  %v2203_v28 = vld [vmem:[#allocation15_spill] sm:$0xff] }
  0xec   : > { %v615_v45 = vsel %vm612_vm3, %v613_v29, %v2195_v35  ;;  %v618_v22 = vsel %vm612_vm3, %v616_v23, %v2196_v62  ;;  %v2198_v19 = vrot.slane %v2151_v60, 2  ;;  %v2199_v39 = vrot.slane %v2159_v40, 2  ;;  %v2201_v23 = vld [vmem:[#allocation41_spill] sm:$0xff] }
  0xed   : > { %v639_v46 = vsel %vm612_vm3, %v637_v15, %v2197_v11  ;;  %v2200_v24 = vrot.slane %v2161_v36, 2  ;;  %v443_v10 = vadd.f32 %v437_v41, %v366_v14  ;;  %v470_v29 = vadd.f32 %v1664_v34, %v394_v30  ;;  %v522_v60 = vld [vmem:[#allocation2 + $0x8] sm:$0xfe] }
  0xee   : > { %v642_v18 = vsel %vm612_vm3, %v640_v4, %v2198_v19  ;;  %v663_v48 = vsel %vm612_vm3, %v661_v21, %v2199_v39  ;;  %v471_v6 = vadd.f32 %v1672_v50, %v395_v7  ;;  %v494_v63 = vadd.f32 %v2201_v23, %v418_v0  ;;  %v523_v4 = vld [vmem:[#allocation2 + $0x20] sm:$0xfe] }
  0xef   : > { %v666_v12 = vsel %vm612_vm3, %v664_v58, %v2200_v24  ;;  %v495_v15 = vadd.f32 %v2202_v16, %v419_v26  ;;  %v528_v40 = vmul.f32 %v2203_v28, %v522_v60  ;;  %v552_v54 = vmul.f32 %v1438_v5, %v522_v60  ;;  %v752_v21 = vld [vmem:[#allocation2 + $0x20] sm:$0xfc]  ;;  %v2204_v58 = vld [vmem:[#allocation31_spill] sm:$0xff] }
  0xf0   : > { %v576_v36 = vmul.f32 %v2144_v57, %v522_v60  ;;  %v757_v41 = vmul.f32 %v2204_v58, %v751_v8  ;;  %v518_v34 = vadd.f32 %v2205_v44, %v442_v59  ;;  %v529_v50 = vmul.f32 %v2203_v28, %v523_v4  ;;  %v2218_v44 = vld [vmem:[#allocation33_spill] sm:$0xff] }
  0xf1   : > { %v553_v14 = vmul.f32 %v1438_v5, %v523_v4  ;;  %v577_v30 = vmul.f32 %v2144_v57, %v523_v4  ;;  %v519_v7 = vadd.f32 %v513_v31, %v443_v10  ;;  %v536_v0 = vrot.slane %v528_v40, 1  ;;  %v2213_v40 = vld [vmem:[#allocation39_spill] sm:$0xff] }
  0xf2   : > { %v560_v26 = vrot.slane %v552_v54, 1  ;;  %v584_v38 = vrot.slane %v576_v36, 1  ;;  %v539_v51 = vrot.slane %v529_v50, 1  ;;  %v758_v61 = vmul.f32 %v2204_v58, %v752_v21 }
  0xf3   : > { %v563_v37 = vrot.slane %v553_v14, 1  ;;  %v587_v55 = vrot.slane %v577_v30, 1  ;;  %v2206_v2 = vrot.slane %v1750_v25, 1  ;;  %v2207_v53 = vrot.slane %v1768_v33, 1 }
  0xf4   : > { %v2208_v5 = vrot.slane %v1799_v47, 1  ;;  %v765_v31 = vrot.slane %v757_v41, 2  ;;  %v2209_v43 = vrot.slane %v1756_v1, 1  ;;  %v2210_v62 = vrot.slane %v1777_v52, 1 }
  0xf5   : > { %v538_v3 = vsel %vm383_vm2, %v536_v0, %v2206_v2  ;;  %v562_v32 = vsel %vm383_vm2, %v560_v26, %v2207_v53  ;;  %v2211_v33 = vrot.slane %v1802_v49, 1  ;;  %v768_v16 = vrot.slane %v758_v61, 2  ;;  %v2215_v49 = vld [vmem:[#allocation40_spill] sm:$0xff]  ;;  %v2224_v61 = vld [vmem:[#allocation47_spill] sm:$0xff] }
  0xf6   : > { %v586_v57 = vsel %vm383_vm2, %v584_v38, %v2208_v5  ;;  %v541_v20 = vsel %vm383_vm2, %v539_v51, %v2209_v43  ;;  %v546_v35 = vadd.f32 %v538_v3, %v470_v29  ;;  %v565_v25 = vsel %vm383_vm2, %v563_v37, %v2210_v62  ;;  %v2212_v29 = vld [vmem:[#allocation32_spill] sm:$0xff]  ;;  %v2222_v37 = vld [vmem:[#allocation46_spill] sm:$0xff] }
  0xf7   : > { %v570_v11 = vadd.f32 %v562_v32, %v494_v63  ;;  %v547_v59 = vadd.f32 %v541_v20, %v471_v6  ;;  %v571_v19 = vadd.f32 %v565_v25, %v495_v15  ;;  %v589_v39 = vsel %vm383_vm2, %v587_v55, %v2211_v33  ;;  %v2214_v63 = vld [vmem:[#allocation44_spill] sm:$0xff] }
  0xf8   : > { %v594_v47 = vadd.f32 %v586_v57, %v518_v34  ;;  %v595_v24 = vadd.f32 %v589_v39, %v519_v7  ;;  %v623_v10 = vadd.f32 %v615_v45, %v546_v35  ;;  %v781_v28 = vmul.f32 %v2212_v29, %v751_v8  ;;  %v2220_v7 = vld [vmem:[#allocation45_spill] sm:$0xff] }
  0xf9   : > { %v647_v23 = vadd.f32 %v639_v46, %v570_v11  ;;  %v624_v1 = vadd.f32 %v618_v22, %v547_v59  ;;  %v648_v60 = vadd.f32 %v642_v18, %v571_v19  ;;  %v782_v15 = vmul.f32 %v2212_v29, %v752_v21 }
  0xfa   : > { %v671_v4 = vadd.f32 %v663_v48, %v594_v47  ;;  %v672_v52 = vadd.f32 %v666_v12, %v595_v24  ;;  %v699_v54 = vadd.f32 %v2213_v40, %v623_v10  ;;  %v2216_v45 = vrot.slane %v1685_v13, 2 }
  0xfb   : > { %v723_v6 = vadd.f32 %v2214_v63, %v647_v23  ;;  %v700_v36 = vadd.f32 %v2215_v49, %v624_v1  ;;  %v724_v58 = vadd.f32 %v718_v27, %v648_v60  ;;  %v789_v22 = vrot.slane %v781_v28, 2 }
  0xfc   : > { %v767_v46 = vsel %vm612_vm3, %v765_v31, %v2216_v45  ;;  %v2217_v18 = vrot.slane %v1689_v42, 2  ;;  %v792_v41 = vrot.slane %v782_v15, 2  ;;  %v805_v34 = vmul.f32 %v2218_v44, %v751_v8 }
  0xfd   : > { %v775_v12 = vadd.f32 %v767_v46, %v699_v54  ;;  %v747_v50 = vadd.f32 %v1927_v17, %v671_v4  ;;  %v2219_v27 = vrot.slane %v1692_v9, 2  ;;  %v806_v30 = vmul.f32 %v2218_v44, %v752_v21 }
  0xfe   : > { %v770_v48 = vsel %vm612_vm3, %v768_v16, %v2217_v18  ;;  %v748_v42 = vadd.f32 %v1934_v56, %v672_v52  ;;  %v2221_v0 = vrot.slane %v2220_v7, 2  ;;  %v813_v8 = vrot.slane %v805_v34, 2 }
  0xff   : > { %v776_v14 = vadd.f32 %v770_v48, %v700_v36  ;;  %v791_v13 = vsel %vm612_vm3, %v789_v22, %v2219_v27  ;;  %827 = vst [vmem:[%s1852_s27] sm:$0xff] %v775_v12  ;;  %v816_v51 = vrot.slane %v806_v30, 2  ;;  %v2223_v9 = vrot.slane %v2222_v37, 2 }
 0x100   : > { %v794_v26 = vsel %vm612_vm3, %v792_v41, %v2221_v0  ;;  %v799_v38 = vadd.f32 %v791_v13, %v723_v6  ;;  %v2225_v21 = vrot.slane %v2224_v61, 2 }
 0x101   : > { %v800_v17 = vadd.f32 %v794_v26, %v724_v58  ;;  %828 = vst [vmem:[%s1852_s27 + $0x8] sm:$0xff] %v776_v14  ;;  %v815_v55 = vsel %vm612_vm3, %v813_v8, %v2223_v9 }
 0x102   : > { %971 = vst [vmem:[%s1852_s27 + $0x20] sm:$0xff] %v799_v38  ;;  %v818_v2 = vsel %vm612_vm3, %v816_v51, %v2225_v21  ;;  %v823_v56 = vadd.f32 %v815_v55, %v747_v50 }
 0x103   : > { %972 = vst [vmem:[%s1852_s27 + $0x28] sm:$0xff] %v800_v17  ;;  %v824_v3 = vadd.f32 %v818_v2, %v748_v42 }
 0x104   : > { %975 = vst [vmem:[%s1852_s27 + $0x40] sm:$0xff] %v823_v56 }
 0x105   : > { %976 = vst [vmem:[%s1852_s27 + $0x48] sm:$0xff] %v824_v3 }
 0x106 PF: > { %p15_p8 = scmp.ge.s32.totalorder %s1199_s17, 6   ;;  %s2226_s12 = smov %s1141_s13 }
 0x107   : > { %s2227_s13 = smov %s1145_s14  ;;  %s2228_s14 = smov %s1209_s20 }
 0x108   : > { %s2229_s15 = smov %s1199_s17  ;;  %17 = sbr.rel (!%p15_p8) target bundleno = 5 (0x5), region = 84 }
 0x10d   :  { %862 = vsyncpa [#allocation4], 1 }
 0x10e   :  { %864 = vsyncpa [#allocation4 + $0x1], 1 }
 0x10f   :  { %865 = vsyncpa [#allocation5], 1 }
 0x110   :  { %867 = vsyncpa [#allocation5 + $0x1], 1 }
 0x111   :  { %868 = vsyncpa [#allocation7], 1 }

</bundles_post_ra>
